<compile_context>
chip_gen: v5e
topology: v5e:2x2
jax: 0.10.0
libtpu: 0.0.40
codegen_flags: <defaults>
</compile_context>

<pallas_src>
from functools import partial

import jax
import jax.numpy as jnp
from jax.experimental import pallas as pl
from jax.experimental.pallas import tpu as pltpu


def sepconv1d_kernel(x_ref, w_ref, chan_ref, o_ref, xpad_ref, *,
                     kernel_size, stride, pad, l_in, l_out, b_tile):
    """Processes one batch tile per grid step (NCW layout, L on lanes).

    x_ref    : (b_tile, C_in, L)       input tile
    w_ref    : (kernel, C_out, C_in)   fused per-tap weights  wp[o,c]*wd[k,c]
    chan_ref : (C_out, 4)              [fused bias | PReLU slope | BN scale | BN shift]
    o_ref    : (b_tile, C_out, L_out)
    xpad_ref : VMEM scratch (b_tile, C_in, L + 2*pad)
    """
    c_in = x_ref.shape[1]
    c_out = o_ref.shape[1]
    l_full = l_in + 2 * pad - kernel_size + 1   # stride-1 output length

    # ---- stage zero-padded input in VMEM (no HBM pad copy) ----
    if pad > 0:
        edge = jnp.zeros((b_tile, c_in, pad), jnp.float32)
        xpad_ref[:, :, pl.ds(0, pad)] = edge
        xpad_ref[:, :, pl.ds(pad + l_in, pad)] = edge
        xpad_ref[:, :, pl.ds(pad, l_in)] = x_ref[...]
        src = xpad_ref
    else:
        src = x_ref

    # ---- per-channel epilogue params, (C_out, 1): broadcast along lanes (L) ----
    bias = chan_ref[:, 0:1]
    slope = chan_ref[:, 1:2]
    scale = chan_ref[:, 2:3]
    shift = chan_ref[:, 3:4]

    # ---- stride decimation as a selection matmul (hoisted out of batch loop) ----
    if stride > 1:
        rows = jax.lax.broadcasted_iota(jnp.int32, (l_full, l_out), 0)
        cols = jax.lax.broadcasted_iota(jnp.int32, (l_full, l_out), 1)
        sel = (rows == cols * stride).astype(jnp.float32)

    for b in range(b_tile):                       # static, small
        acc = jnp.zeros((c_out, l_full), jnp.float32)
        for k in range(kernel_size):              # static, small (depthwise fused into MXU)
            slab = src[b, :, pl.ds(k, l_full)]    # (C_in, l_full), lane-contiguous
            acc = acc + jnp.dot(w_ref[k], slab,
                                preferred_element_type=jnp.float32)
        if stride > 1:
            acc = jnp.dot(acc, sel, preferred_element_type=jnp.float32)
        y = acc + bias
        y = jnp.where(y >= 0, y, slope * y)       # PReLU (shared slope, broadcast per channel)
        y = y * scale + shift                     # BatchNorm1d (eval), folded
        o_ref[b, :, :] = y


def sepconv1d_forward(x, params, *, kernel, stride, pad, eps=1e-5, b_tile=None):
    """x: (N, C_in, L) float32 -> (N, C_out, L_out) float32 (eval-mode BN)."""
    N, C_in, L = x.shape
    wd = params["wd"].astype(jnp.float32)          # (kernel, C_in) depthwise taps
    bd = params["bd"].astype(jnp.float32)          # (C_in,)
    wp = params["wp"].astype(jnp.float32)          # (C_in, C_out)  pointwise
    bp = params["bp"].astype(jnp.float32)          # (C_out,)
    C_out = wp.shape[1]
    L_out = (L + 2 * pad - kernel) // stride + 1

    # ---- host-side folding (tiny): depthwise into pointwise, BN into scale/shift ----
    w_fused = (wd[:, None, :] * wp.T[None, :, :]).astype(jnp.float32)   # (kernel, C_out, C_in)
    bias_fused = bp + bd @ wp                                           # (C_out,)
    bn_scale = params["gamma"] / jnp.sqrt(params["var"] + eps)
    bn_shift = params["beta"] - params["mean"] * bn_scale
    a = params["a"].reshape(-1)
    slope = jnp.broadcast_to(a[:1], (C_out,)) if a.size == 1 else a
    chan_pack = jnp.stack([bias_fused, slope, bn_scale, bn_shift],
                          axis=1).astype(jnp.float32)                   # (C_out, 4)

    if b_tile is None:
        # biggest divisor of N up to 8 that still leaves >= 2 grid steps
        # (keeps a "parallel" axis busy on both v7x TensorCores)
        cands = [d for d in range(1, min(N, 8) + 1)
                 if N % d == 0 and (N // d >= 2 or N == 1)]
        b_tile = max(cands) if cands else 1
    assert N % b_tile == 0, "b_tile must divide N"

    out = pl.pallas_call(
        partial(sepconv1d_kernel, kernel_size=kernel, stride=stride, pad=pad,
                l_in=L, l_out=L_out, b_tile=b_tile),
        out_shape=jax.ShapeDtypeStruct((N, C_out, L_out), jnp.float32),
        grid=(N // b_tile,),
        in_specs=[
            pl.BlockSpec((b_tile, C_in, L), lambda n: (n, 0, 0)),
            pl.BlockSpec((kernel, C_out, C_in), lambda n: (0, 0, 0)),
            pl.BlockSpec((C_out, 4), lambda n: (0, 0)),
        ],
        out_specs=pl.BlockSpec((b_tile, C_out, L_out), lambda n: (n, 0, 0)),
        scratch_shapes=[pltpu.VMEM((b_tile, C_in, L + 2 * pad), jnp.float32)],
        compiler_params=pltpu.CompilerParams(
            dimension_semantics=("parallel",)),
    )(x.astype(jnp.float32), w_fused, chan_pack)
    return out


def ref_forward(x, params, *, kernel, stride, pad, eps=1e-5):
    """Pure-jnp reference mirroring the PyTorch forward (eval-mode BN)."""
    N, C_in, L = x.shape
    xp = jnp.pad(x, ((0, 0), (0, 0), (pad, pad)))
    L_out = (L + 2 * pad - kernel) // stride + 1
    idx = jnp.arange(L_out) * stride
    dw = jnp.zeros((N, C_in, L_out), jnp.float32)
    for k in range(kernel):
        dw = dw + xp[:, :, idx + k] * params["wd"][k][None, :, None]
    dw = dw + params["bd"][None, :, None]
    y = jnp.einsum("ncl,co->nol", dw, params["wp"]) + params["bp"][None, :, None]
    a = params["a"].reshape(-1)[0]
    y = jnp.where(y >= 0, y, a * y)
    scale = params["gamma"] / jnp.sqrt(params["var"] + eps)
    shift = params["beta"] - params["mean"] * scale
    return y * scale[None, :, None] + shift[None, :, None]


def _make_params(key, ni, no, kernel):
    ks = jax.random.split(key, 8)
    # depthwise Conv1d(ni, ni, kernel, groups=ni): weight (ni,1,kernel) stored as (kernel, ni)
    wd = 0.3 * jax.random.normal(ks[0], (kernel, ni), jnp.float32)
    bd = 0.1 * jax.random.normal(ks[1], (ni,), jnp.float32)
    # pointwise Conv1d(ni, no, 1): weight (no, ni, 1) stored as (ni, no)
    wp = 0.3 * jax.random.normal(ks[2], (ni, no), jnp.float32)
    bp = 0.1 * jax.random.normal(ks[3], (no,), jnp.float32)
    a = jnp.array([0.25], jnp.float32)            # PReLU default: 1 shared param, init 0.25
    gamma = 1.0 + 0.1 * jax.random.normal(ks[4], (no,), jnp.float32)
    beta = 0.1 * jax.random.normal(ks[5], (no,), jnp.float32)
    mean = 0.1 * jax.random.normal(ks[6], (no,), jnp.float32)
    var = 0.5 + jnp.abs(jax.random.normal(ks[7], (no,), jnp.float32))
    return dict(wd=wd, bd=bd, wp=wp, bp=bp, a=a,
                gamma=gamma, beta=beta, mean=mean, var=var)


if __name__ == "__main__":
    key = jax.random.PRNGKey(0)

    # --- config 1: SepConv1d(ni=4, no=8, kernel=3, stride=1, pad=1), N=2, L=16 ---
    ni, no, kernel, stride, pad = 4, 8, 3, 1, 1
    N, L = 2, 16
    k_p, k_x, key = jax.random.split(key, 3)
    params = _make_params(k_p, ni, no, kernel)
    x = jax.random.normal(k_x, (N, ni, L), jnp.float32)
    out = jax.block_until_ready(
        sepconv1d_forward(x, params, kernel=kernel, stride=stride, pad=pad))
    ref = ref_forward(x, params, kernel=kernel, stride=stride, pad=pad)
    assert out.shape == (N, no, (L + 2 * pad - kernel) // stride + 1)
    assert jnp.allclose(out, ref, atol=1e-5, rtol=1e-5), "config1 mismatch vs reference"

    # --- config 2: strided case + multi-batch block (decimation matmul, b_tile=2) ---
    ni, no, kernel, stride, pad = 4, 8, 5, 2, 2
    N, L = 4, 64
    k_p, k_x, key = jax.random.split(key, 3)
    params = _make_params(k_p, ni, no, kernel)
    x = jax.random.normal(k_x, (N, ni, L), jnp.float32)
    out = jax.block_until_ready(
        sepconv1d_forward(x, params, kernel=kernel, stride=stride, pad=pad))
    ref = ref_forward(x, params, kernel=kernel, stride=stride, pad=pad)
    assert out.shape == (N, no, (L + 2 * pad - kernel) // stride + 1)
    assert jnp.allclose(out, ref, atol=1e-5, rtol=1e-5), "config2 mismatch vs reference"

    print("KERNEL_OK")
</pallas_src>

<mosaic_0001>
module attributes {stable_mosaic.version = 11 : i64} {
  func.func @sepconv1d_kernel(%arg0: i32, %arg1: memref<1x4x16xf32, #tpu.memory_space<vmem>>, %arg2: memref<3x8x4xf32, #tpu.memory_space<vmem>>, %arg3: memref<8x4xf32, #tpu.memory_space<vmem>>, %arg4: memref<1x8x16xf32, #tpu.memory_space<vmem>>, %arg5: memref<1x4x18xf32, #tpu.memory_space<vmem>>) attributes {dimension_semantics = [#tpu.dimension_semantics<parallel>], iteration_bounds = array<i64: 2>, scalar_prefetch = 0 : i64, scratch_operands = 1 : i64, tpu.core_type = #tpu.core_type<tc>, window_params = [{transform_indices = @transform_0, window_bounds = array<i64: 1, 4, 16>}, {pipeline_mode = #tpu.pipeline_mode<synchronous>, transform_indices = @transform_1, window_bounds = array<i64: 3, 8, 4>}, {pipeline_mode = #tpu.pipeline_mode<synchronous>, transform_indices = @transform_2, window_bounds = array<i64: 8, 4>}, {transform_indices = @transform_3, window_bounds = array<i64: 1, 8, 16>}]} {
    %cst = arith.constant 0.000000e+00 : f32
    %0 = vector.broadcast %cst : f32 to vector<1x4x1xf32>
    %c0 = arith.constant 0 : index
    %c0_0 = arith.constant 0 : index
    %c0_1 = arith.constant 0 : index
    %1 = vector.load %arg5[%c0, %c0_0, %c0_1] : memref<1x4x18xf32, #tpu.memory_space<vmem>>, vector<1x4x1xf32>
    tpu.vector_store %arg5[%c0, %c0_0, %c0_1], %0 {strides = array<i32>} : memref<1x4x18xf32, #tpu.memory_space<vmem>>, vector<1x4x1xf32>,
    %c0_2 = arith.constant 0 : index
    %c0_3 = arith.constant 0 : index
    %c17 = arith.constant 17 : index
    %2 = vector.load %arg5[%c0_2, %c0_3, %c17] : memref<1x4x18xf32, #tpu.memory_space<vmem>>, vector<1x4x1xf32>
    tpu.vector_store %arg5[%c0_2, %c0_3, %c17], %0 {strides = array<i32>} : memref<1x4x18xf32, #tpu.memory_space<vmem>>, vector<1x4x1xf32>,
    %c0_4 = arith.constant 0 : index
    %c0_5 = arith.constant 0 : index
    %c0_6 = arith.constant 0 : index
    %3 = vector.load %arg1[%c0_4, %c0_5, %c0_6] : memref<1x4x16xf32, #tpu.memory_space<vmem>>, vector<1x4x16xf32>
    %c0_7 = arith.constant 0 : index
    %c0_8 = arith.constant 0 : index
    %c1 = arith.constant 1 : index
    %4 = vector.load %arg5[%c0_7, %c0_8, %c1] : memref<1x4x18xf32, #tpu.memory_space<vmem>>, vector<1x4x16xf32>
    tpu.vector_store %arg5[%c0_7, %c0_8, %c1], %3 {strides = array<i32>} : memref<1x4x18xf32, #tpu.memory_space<vmem>>, vector<1x4x16xf32>,
    %c0_9 = arith.constant 0 : index
    %c0_10 = arith.constant 0 : index
    %5 = vector.load %arg3[%c0_9, %c0_10] : memref<8x4xf32, #tpu.memory_space<vmem>>, vector<8x1xf32>
    %c0_11 = arith.constant 0 : index
    %c1_12 = arith.constant 1 : index
    %6 = vector.load %arg3[%c0_11, %c1_12] : memref<8x4xf32, #tpu.memory_space<vmem>>, vector<8x1xf32>
    %c0_13 = arith.constant 0 : index
    %c2 = arith.constant 2 : index
    %7 = vector.load %arg3[%c0_13, %c2] : memref<8x4xf32, #tpu.memory_space<vmem>>, vector<8x1xf32>
    %c0_14 = arith.constant 0 : index
    %c3 = arith.constant 3 : index
    %8 = vector.load %arg3[%c0_14, %c3] : memref<8x4xf32, #tpu.memory_space<vmem>>, vector<8x1xf32>
    %cst_15 = arith.constant 0.000000e+00 : f32
    %9 = vector.broadcast %cst_15 : f32 to vector<8x16xf32>
    %c0_16 = arith.constant 0 : index
    %c0_17 = arith.constant 0 : index
    %c0_18 = arith.constant 0 : index
    %10 = vector.load %arg5[%c0_16, %c0_17, %c0_18] : memref<1x4x18xf32, #tpu.memory_space<vmem>>, vector<1x4x16xf32>
    %11 = vector.shape_cast %10 : vector<1x4x16xf32> to vector<4x16xf32>
    %c0_19 = arith.constant 0 : index
    %c0_20 = arith.constant 0 : index
    %c0_21 = arith.constant 0 : index
    %12 = vector.load %arg2[%c0_19, %c0_20, %c0_21] : memref<3x8x4xf32, #tpu.memory_space<vmem>>, vector<1x8x4xf32>
    %13 = vector.shape_cast %12 : vector<1x8x4xf32> to vector<8x4xf32>
    %cst_22 = arith.constant dense<0.000000e+00> : vector<8x16xf32>
    %14 = tpu.matmul %13, %11, %cst_22 {dimension_numbers = #tpu.dot_dimension_numbers<[1], [0], [0], [1], [0, 0, 1, 1], [], []>} : vector<8x4xf32>, vector<4x16xf32>, vector<8x16xf32> -> vector<8x16xf32>
    %15 = arith.addf %9, %14 : vector<8x16xf32>
    %c0_23 = arith.constant 0 : index
    %c0_24 = arith.constant 0 : index
    %c1_25 = arith.constant 1 : index
    %16 = vector.load %arg5[%c0_23, %c0_24, %c1_25] : memref<1x4x18xf32, #tpu.memory_space<vmem>>, vector<1x4x16xf32>
    %17 = vector.shape_cast %16 : vector<1x4x16xf32> to vector<4x16xf32>
    %c1_26 = arith.constant 1 : index
    %c0_27 = arith.constant 0 : index
    %c0_28 = arith.constant 0 : index
    %18 = vector.load %arg2[%c1_26, %c0_27, %c0_28] : memref<3x8x4xf32, #tpu.memory_space<vmem>>, vector<1x8x4xf32>
    %19 = vector.shape_cast %18 : vector<1x8x4xf32> to vector<8x4xf32>
    %cst_29 = arith.constant dense<0.000000e+00> : vector<8x16xf32>
    %20 = tpu.matmul %19, %17, %cst_29 {dimension_numbers = #tpu.dot_dimension_numbers<[1], [0], [0], [1], [0, 0, 1, 1], [], []>} : vector<8x4xf32>, vector<4x16xf32>, vector<8x16xf32> -> vector<8x16xf32>
    %21 = arith.addf %15, %20 : vector<8x16xf32>
    %c0_30 = arith.constant 0 : index
    %c0_31 = arith.constant 0 : index
    %c2_32 = arith.constant 2 : index
    %22 = vector.load %arg5[%c0_30, %c0_31, %c2_32] : memref<1x4x18xf32, #tpu.memory_space<vmem>>, vector<1x4x16xf32>
    %23 = vector.shape_cast %22 : vector<1x4x16xf32> to vector<4x16xf32>
    %c2_33 = arith.constant 2 : index
    %c0_34 = arith.constant 0 : index
    %c0_35 = arith.constant 0 : index
    %24 = vector.load %arg2[%c2_33, %c0_34, %c0_35] : memref<3x8x4xf32, #tpu.memory_space<vmem>>, vector<1x8x4xf32>
    %25 = vector.shape_cast %24 : vector<1x8x4xf32> to vector<8x4xf32>
    %cst_36 = arith.constant dense<0.000000e+00> : vector<8x16xf32>
    %26 = tpu.matmul %25, %23, %cst_36 {dimension_numbers = #tpu.dot_dimension_numbers<[1], [0], [0], [1], [0, 0, 1, 1], [], []>} : vector<8x4xf32>, vector<4x16xf32>, vector<8x16xf32> -> vector<8x16xf32>
    %27 = arith.addf %21, %26 : vector<8x16xf32>
    %28 = vector.broadcast %5 : vector<8x1xf32> to vector<8x16xf32>
    %29 = arith.addf %27, %28 : vector<8x16xf32>
    %cst_37 = arith.constant 0.000000e+00 : f32
    %30 = vector.broadcast %cst_37 : f32 to vector<8x16xf32>
    %31 = arith.cmpf oge, %29, %30 : vector<8x16xf32>
    %32 = vector.broadcast %6 : vector<8x1xf32> to vector<8x16xf32>
    %33 = arith.mulf %32, %29 : vector<8x16xf32>
    %34 = arith.select %31, %29, %33 : vector<8x16xi1>, vector<8x16xf32>
    %35 = vector.broadcast %7 : vector<8x1xf32> to vector<8x16xf32>
    %36 = arith.mulf %34, %35 : vector<8x16xf32>
    %37 = vector.broadcast %8 : vector<8x1xf32> to vector<8x16xf32>
    %38 = arith.addf %36, %37 : vector<8x16xf32>
    %c0_38 = arith.constant 0 : index
    %c0_39 = arith.constant 0 : index
    %c0_40 = arith.constant 0 : index
    %39 = vector.load %arg4[%c0_38, %c0_39, %c0_40] : memref<1x8x16xf32, #tpu.memory_space<vmem>>, vector<1x8x16xf32>
    %40 = vector.shape_cast %39 : vector<1x8x16xf32> to vector<8x16xf32>
    %41 = vector.shape_cast %38 : vector<8x16xf32> to vector<1x8x16xf32>
    tpu.vector_store %arg4[%c0_38, %c0_39, %c0_40], %41 {strides = array<i32>} : memref<1x8x16xf32, #tpu.memory_space<vmem>>, vector<1x8x16xf32>,
    return
  }
  func.func @transform_0(%arg0: i32) -> (i32, i32, i32) {
    %c0_i32 = arith.constant 0 : i32
    %c0_i32_0 = arith.constant 0 : i32
    %c0_i32_1 = arith.constant 0 : i32
    return %arg0, %c0_i32, %c0_i32_0 : i32, i32, i32
  }
  func.func @transform_1(%arg0: i32) -> (i32, i32, i32) {
    %c0_i32 = arith.constant 0 : i32
    %c0_i32_0 = arith.constant 0 : i32
    %c0_i32_1 = arith.constant 0 : i32
    %c0_i32_2 = arith.constant 0 : i32
    return %c0_i32, %c0_i32_0, %c0_i32_1 : i32, i32, i32
  }
  func.func @transform_2(%arg0: i32) -> (i32, i32) {
    %c0_i32 = arith.constant 0 : i32
    %c0_i32_0 = arith.constant 0 : i32
    %c0_i32_1 = arith.constant 0 : i32
    return %c0_i32, %c0_i32_0 : i32, i32
  }
  func.func @transform_3(%arg0: i32) -> (i32, i32, i32) {
    %c0_i32 = arith.constant 0 : i32
    %c0_i32_0 = arith.constant 0 : i32
    %c0_i32_1 = arith.constant 0 : i32
    return %arg0, %c0_i32, %c0_i32_0 : i32, i32, i32
  }
}

</mosaic_0001>

<bundles_post_ra>
// kernel: tpu_custom_call.1
= control target key start
LH: loop header
LB: loop body
LE: loop exit
PB: predicated region body
PF: predicated region fallthrough
CT: control target
= control target key end

     0   :  { %8 = vsyncpa [#allocation4], 0  ;;  %s631_s0 = inlined_call_operand.vmem [shape: f32[2,4,16], index: 0, kind: input, shape index: {}]   ;;  %s632_s1 = inlined_call_operand.vmem [shape: f32[3,8,4], index: 1, kind: input, shape index: {}]   ;;  %s633_s2 = inlined_call_operand.vmem [shape: f32[8,4], index: 2, kind: input, shape index: {}]   ;;  %s634_s3 = inlined_call_operand.hbm [shape: f32[2,8,16], index: 3, kind: output, shape index: {}]  }
   0x1   :  { %10 = vsyncpa [#allocation4 + $0x1], 0  ;;  %s528_s12 = smov 0   ;;  %s530_s13 = smov 0  }
   0x2   :  { %s532_s14 = smov 0   ;;  %s534_s15 = smov 0  }
   0x3 LB: > { %s549_s16 = sadd.s32 4294967295, %s498_s15   ;;  %s367_s17 = sadd.s32 4294967294, %s498_s15   ;;  %s498_s15 = sphi %s534_s15, %s640_s15   ;;  %s494_s14 = sphi %s532_s14, %s639_s14   ;;  %s490_s13 = sphi %s530_s13, %s638_s13   ;;  %s486_s12 = sphi %s528_s12, %s637_s12  }
   0x4   : > { %s553_s18 = sadd.s32 1, %s498_s15   ;;  %s91_s19 = sadd.s32 1, %s494_s14 }
   0x5   : > { %s88_s20 = ssub.s32 %s498_s15, %s553_s18  ;;  %p101_p0 = scmp.ne.s32.totalorder %s494_s14, %s490_s13 }
   0x6   : > { %p89_p1 = scmp.eq.s32.totalorder %s88_s20, 0  ;;  %p102_p2 = scmp.eq.s32.totalorder %s549_s16, 1 }
   0x7   : > { %p107_p3 = scmp.ne.s32.totalorder %s490_s13, %s486_s12  ;;  %p108_p4 = scmp.eq.s32.totalorder %s367_s17, 1 }
   0x8   : > { %s564_s21 = scalar_select %p89_p1, %s494_s14, %s91_s19  }
   0x9   : > { %p566_p5 = por %p102_p2, %p101_p0  ;;  %p570_p6 = por %p108_p4, %p107_p3 }
   0xa   : > { %p370_p7 = scmp.ge.s32.totalorder %s498_s15, 1  ;;  %p139_p8 = scmp.lt.s32.totalorder %s498_s15, 3 }
   0xc   : > { %p140_p9 = pnand %p370_p7, %p139_p8 }
   0xd   : > { %p162_p10 = scmp.lt.s32.totalorder (!%p140_p9), %s549_s16, 1  ;;  %s501_s29 = smov (!%p140_p9), 1  }
   0xe   : > { %143 = sbr.rel (%p140_p9) target bundleno = 409 (0x199), region = 32  ;;  %s502_s30 = smov (!%p140_p9), 127  }
   0xf   : > { %s503_s4 = smov (!%p140_p9), 126   ;;  %s159_s19 = sand.u32 (!%p140_p9), 1, %s490_s13  }
  0x10   : > { %s371_s20 = sshll.u32 (!%p140_p9), %s159_s19, 3  ;;  %s456_s8 = scalar_lea.hbm (!%p140_p9), %s634_s3, 16 }
  0x13   : > { %vm166_vm0 = vcmask 3072   ;;  %vm168_vm1 = vcmask 142472   ;;  %v500_v0 = vmov 0.0   ;;  %s163_s24 = scalar_select %p162_p10, %s549_s16, 1  ;;  %vm175_vm2 = vcmask 134152   ;;  %v179_v4 = vld [vmem:[%s632_s1] sm:$0xff] }
  0x14   : > { %167 = vst.msk [vmem:[#allocation2] sm:$0xf] %vm166_vm0, %v500_v0  ;;  %vm189_vm3 = vcmask 1043456   ;;  %vm185_vm4 = vcmask 31744   ;;  %v177_v5 = vld [vmem:[%s633_s2] sm:$0xff]  ;;  %v504_v6 = vmov 0  }
  0x15   : > { %169 = vst.msk [vmem:[#allocation2] sm:$0xf] %vm168_vm1, %v500_v0  ;;  %s372_s25 = sshll.u32 %s163_s24, 2  ;;  %432 = vset.pattern.permute.xlu1 %v504_v6  ;;  %v505_v7 = vmov 3   ;;  %v506_v8 = vmov 1   ;;  %v507_v9 = vmov 2  }
  0x16   : > { %s165_s28 = scalar_lea.vmem %s631_s0, %s372_s25  ;;  %435 = vset.pattern.permute.xlu0 %v505_v7  ;;  %433 = vset.pattern.permute.xlu2 %v506_v8  ;;  %v378_v10 = vld [vmem:[%s632_s1 + $0x10] sm:$0xff]  ;;  %v373_v11 = vld [vmem:[%s632_s1 + $0x8] sm:$0xff]  ;;  %s382_s24 = sshll.u32 %s549_s16, 3  ;;  %vm290_vm6 = vcmask 130048  }
  0x17   : > { %v170_v1 = vld [vmem:[%s165_s28] sm:$0xf]  ;;  %275 = vperm.xlu2 %433, %v177_v5   ;;  %s303_s27 = scalar_lea.hbm %s634_s3, %s382_s24  ;;  %s161_s28 = scalar_lea.vmem [#allocation3], %s371_s20 }
  0x18   : > { %172 = vrot.lane.b32.xlu0 %v170_v1, %s501_s29  ;;  %s305_s29 = sshll.u32 %s161_s28, 4  ;;  %s293_s16 = scalar_lea.sflag [#allocation4], %s159_s19  ;;  %s306_s29 = int_to_ptr.vmem [resolvable:$true] %s305_s29 }
  0x1f   : > { %434 = vset.pattern.permute.xlu2 %v507_v9 }
  0x20   : > { %281 = vperm.xlu2 %434, %v177_v5  }
  0x71   : > { %v276_v16 = vpop.permute.xlu2 %275 }
  0x7a   : > { %v282_v23 = vpop.permute.xlu2 %281 }
  0x8a   : > { %v173_v2 = vpop.permute.xlu0 %172 }
  0x8b   : > { %176 = vst.msk [vmem:[#allocation2] sm:$0xf] %vm175_vm2, %v173_v2 }
  0x92   : > { %v178_v3 = vld [vmem:[#allocation2] sm:$0xf] }
  0x93   : > { %183 = vrot.lane.b32.xlu1 %v178_v3, %s502_s30  ;;  %239 = vrot.lane.b32.xlu0 %v178_v3, %s503_s4  ;;  %s307_s30 = sshll.u32 %s303_s27, 4  ;;  %s308_s30 = int_to_ptr.hbm [resolvable:$true] %s307_s30 }
  0x94   : > { %376 = vmatpush.msk.msra.mxu1 %vm189_vm3, %v178_v3  ;;  %s450_s4 = sshra.s32 %s308_s30, 4  ;;  %s451_s4 = int_to_ptr.hbm [resolvable:$true] %s450_s4 }
  0x95   : > { %377 = vmatmul.msk.f32.vlgmr.msra.gmra.mxu1 %vm185_vm4, %v179_v4  ;;  %s452_s5 = scalar_lea.hbm %s451_s4, 8  ;;  %p457_p0 = scmp.lt.s32.totalorder %s451_s4, %s634_s3 }
  0x96   : > { %p453_p11 = scmp.ne.s32.totalorder %s451_s4, %s452_s5  ;;  %p458_p1 = scmp.lt.s32.totalorder %s456_s8, %s452_s5 }
  0x98   : > { %p454_p12 = pnand %p453_p11, %p566_p5  ;;  %p459_p2 = por %p458_p1, %p457_p0 }
  0x9a   : > { %p455_p13 = pneg %p454_p12 }
  0x9b   : > { %269 = vperm.xlu1 %432, %v177_v5   ;;  %286 = vperm.xlu0 %435, %v177_v5  }
  0x9c   : > { %p460_p3 = pnand %p459_p2, %p455_p13 }
 0x105   : > { %v184_v12 = vpop.permute.xlu1 %183  ;;  %v240_v13 = vpop.permute.xlu0 %239 }
 0x106   : > { %374 = vmatpush.msk.msra.mxu0 %vm189_vm3, %v184_v12  ;;  %379 = vmatpush.msk.msra.mxu2 %vm189_vm3, %v240_v13 }
 0x107   : > { %380 = vmatmul.msk.f32.vlgmr.msra.gmra.mxu2 %vm185_vm4, %v378_v10  ;;  %375 = vmatmul.msk.f32.vlgmr.msra.gmra.mxu0 %vm185_vm4, %v373_v11 }
 0x10d   : > { %v270_v19 = vpop.permute.xlu1 %269  ;;  %v287_v25 = vpop.permute.xlu0 %286 }
 0x112   : > { %v234_v15 = vpop.f32.mrf.mxu1 }
 0x184   : > { %v209_v14 = vpop.f32.mrf.mxu0 }
 0x185   : > { %v235_v17 = vadd.f32 %v234_v15, %v209_v14 }
 0x18a   : > { %v263_v18 = vpop.f32.mrf.mxu2 }
 0x18b   : > { %v266_v20 = vadd.f32 %v263_v18, %v235_v17 }
 0x18d   : > { %v272_v21 = vadd.f32 %v270_v19, %v266_v20 }
 0x18f   : > { %v278_v22 = vmul.f32 %v276_v16, %v272_v21  ;;  %vm273_vm5 = vcmp.ge.f32.partialorder %v272_v21, 0.0 }
 0x191   : > { %v279_v24 = vsel %vm273_vm5, %v272_v21, %v278_v22 }
 0x192   : > { %v284_v26 = vmul.f32 %v282_v23, %v279_v24 }
 0x194   : > { %v289_v27 = vadd.f32 %v287_v25, %v284_v26 }
 0x196   : > { %291 = vst.msk [vmem:[%s161_s28] sm:$0xff] %vm290_vm6, %v289_v27 }
 0x197   : > { %463 = shalt.err (!%p460_p3)
}
 0x198   : > { %385 = dma.vmem_to_hbm [thread:$0]  (%p566_p5), %s306_s29, 128, %s308_s30, %s293_s16  }
 0x199 PF: > { %p391_p4 = scmp.ge.s32.totalorder %s498_s15, 2  ;;  %s319_s11 = sand.u32 1, %s486_s12  }
 0x19a   : > { %s320_s17 = scalar_lea.sflag [#allocation4], %s319_s11 }
 0x19b   : > { %p388_p7 = pnand %p391_p4, %p570_p6 }
 0x19d   : > { %p389_p8 = pneg %p388_p7 }
 0x19f   : > { %481 = dma.done.wait (%p389_p8), %s320_s17, 128  }
 0x1a0   : > { %483 = vsyncadd (%p389_p8), %s320_s17, 4294967168  ;;  %p13_p9 = scmp.ge.s32.totalorder %s553_s18, 4   ;;  %s637_s12 = smov %s490_s13 }
 0x1a1   : > { %s638_s13 = smov %s494_s14  ;;  %s639_s14 = smov %s564_s21 }
 0x1a2   : > { %s640_s15 = smov %s553_s18  ;;  %15 = sbr.rel (!%p13_p9) target bundleno = 3 (0x3), region = 69 }
 0x1a7   :  { %326 = vsyncpa [#allocation4], 1 }
 0x1a8   :  { %328 = vsyncpa [#allocation4 + $0x1], 1 }

</bundles_post_ra>
